<compile_context>
chip_gen: v6e
topology: v6e:2x2x1
jax: 0.10.0
libtpu: 0.0.40
codegen_flags: <defaults>
</compile_context>

<pallas_src>
import functools

import jax
import jax.numpy as jnp
from jax import lax
from jax.experimental import pallas as pl
from jax.experimental.pallas import tpu as pltpu

# ---- shapes consistent with the module: x is (B, C, N), Linear dim == N ----
B = 2
C = 64            # tokens (second dim)
DIM = 128         # N == Linear dim (multiple of 128 -> lane-dense inputs)
SCALE = DIM ** -0.5


# ---------------- Pallas kernel ----------------
# Layout convention (all arrays pre-flattened to 2-D in the wrapper, which is
# free because the reshapes are contiguous):
#   x_ref   : (bb*C, N)   input rows for this grid step (bb batch elems)
#   xr_ref  : (bb*N, C)   the SAME input viewed in the output (permuted) layout
#   wqkv    : (N, 3N)     fused [Wq*scale | Wk | Wv]^T   (resident)
#   bqkv    : (1, 3N)     fused [bq*scale | bk | bv]     (resident)
#   o_ref   : (bb*N, C)   (attn @ v)^T + residual, per batch element
def _tablock_kernel(x_ref, xr_ref, wqkv_ref, bqkv_ref, o_ref, *, c: int, n: int):
    bb = x_ref.shape[0] // c          # batch elements handled in this grid step

    # Fused q/k/v projection, batch stacked into the M dim: (bb*C, N) @ (N, 3N).
    qkv = jnp.dot(x_ref[...], wqkv_ref[...], preferred_element_type=jnp.float32)
    qkv = qkv + bqkv_ref[...]                                   # (bb*C, 3N)

    # Identity matrix used to transpose attn@v on the MXU (bit-exact, and the
    # MXU has plenty of slack here).  Built from 2-D iota (TPU-safe).
    rows = lax.broadcasted_iota(jnp.int32, (n, n), 0)
    cols = lax.broadcasted_iota(jnp.int32, (n, n), 1)
    eye_n = (rows == cols).astype(jnp.float32)                  # (N, N)

    nt = (((1,), (1,)), ((), ()))     # contract last dims: A @ B^T

    for b in range(bb):               # static unroll (bb is 1 or 2)
        q = qkv[b * c:(b + 1) * c, 0:n]                         # (C, N), scale folded in
        k = qkv[b * c:(b + 1) * c, n:2 * n]                     # (C, N)
        v = qkv[b * c:(b + 1) * c, 2 * n:3 * n]                 # (C, N)

        # attention scores without materializing k^T
        s = lax.dot_general(q, k, nt, preferred_element_type=jnp.float32)   # (C, C)
        s = s - jnp.max(s, axis=-1, keepdims=True)
        e = jnp.exp(s)
        den = jnp.sum(e, axis=-1, keepdims=True)
        r = pl.reciprocal(den, approx=True)                     # EUP fast path
        r = r * (2.0 - den * r)                                 # one Newton step
        p = e * r                                               # softmax rows (C, C)

        y = jnp.dot(p, v, preferred_element_type=jnp.float32)   # (C, N)
        # (attn @ v)^T via MXU identity matmul: yT[n', c'] = y[c', n']
        yT = lax.dot_general(eye_n, y, nt, preferred_element_type=jnp.float32)  # (N, C)

        # residual added directly in the output layout
        o_ref[b * n:(b + 1) * n, :] = yT + xr_ref[b * n:(b + 1) * n, :]


# ---------------- one-time parameter prep (hoisted out of forward) ----------
def make_fused_params(params, dim):
    scale = dim ** -0.5
    wqkv = jnp.concatenate(
        [params["wq"].T * scale, params["wk"].T, params["wv"].T], axis=1)   # (N, 3N)
    bqkv = jnp.concatenate(
        [params["bq"] * scale, params["bk"], params["bv"]])[None, :]        # (1, 3N)
    return wqkv, bqkv


# ---------------- generation gate: TensorCores per JAX device ---------------
def _single_tensorcore_chip() -> bool:
    """Best effort: v5e/v6e have 1 TC per device; v4/v5p/v7x expose 2 (megacore)."""
    try:
        kind = jax.devices()[0].device_kind.lower()
    except Exception:
        return False
    return any(tag in kind for tag in ("lite", "v5e", "v6e"))


# ---------------- wrapper ----------------
@jax.jit
def tablock_forward(x, wqkv, bqkv):
    b, c, n = x.shape
    assert n % 128 == 0 and c % 8 == 0

    # Single-TC chips: one grid step, batch stacked into M.  Dual-TC chips:
    # one batch element per grid step, sharded across cores via "parallel".
    bb = b if _single_tensorcore_chip() else 1
    if b % bb:
        bb = 1

    x2 = x.reshape(b * c, n)     # contiguous reshape -> bitcast (free)
    xr = x.reshape(b * n, c)     # residual viewed in the output layout (free)

    kernel = functools.partial(_tablock_kernel, c=c, n=n)
    w = pl.pallas_call(
        kernel,
        out_shape=jax.ShapeDtypeStruct((b * n, c), jnp.float32),
        grid=(b // bb,),
        in_specs=[
            pl.BlockSpec((bb * c, n), lambda i: (i, 0)),        # x rows
            pl.BlockSpec((bb * n, c), lambda i: (i, 0)),        # residual (output layout)
            pl.BlockSpec((n, 3 * n), lambda i: (0, 0)),         # fused QKV weight (resident)
            pl.BlockSpec((1, 3 * n), lambda i: (0, 0)),         # fused QKV bias (resident)
        ],
        out_specs=pl.BlockSpec((bb * n, c), lambda i: (i, 0)),
        compiler_params=pltpu.CompilerParams(dimension_semantics=("parallel",)),
    )(x2, xr, wqkv, bqkv)

    # contiguous reshape back to (B, C, N) -> bitcast (free)
    # TODO(synk): proj_drop (nn.Dropout p=0.1) is identity at inference and is omitted.
    return w.reshape(b, c, n)


# ---------------- pure-JAX reference (mirrors the torch code) ----------------
def tablock_reference(x, params):
    hp = lax.Precision.HIGHEST
    q = jnp.dot(x, params["wq"].T, precision=hp) + params["bq"]
    k = jnp.dot(x, params["wk"].T, precision=hp) + params["bk"]
    v = jnp.dot(x, params["wv"].T, precision=hp) + params["bv"]
    attn = jnp.einsum("bcn,bdn->bcd", q, k, precision=hp) * SCALE
    attn = jax.nn.softmax(attn, axis=-1)
    y = jnp.einsum("bcd,bdn->bcn", attn, v, precision=hp)          # (B, C, N)
    y = jnp.swapaxes(y, 1, 2).reshape(x.shape)                     # transpose(1,2).reshape
    return y + x


# ---------------- parameter init ----------------
def init_params(key):
    ks = jax.random.split(key, 6)
    return dict(
        wq=jax.random.normal(ks[0], (DIM, DIM), jnp.float32) * 0.02,
        wk=jax.random.normal(ks[1], (DIM, DIM), jnp.float32) * 0.02,
        wv=jax.random.normal(ks[2], (DIM, DIM), jnp.float32) * 0.02,
        bq=jax.random.normal(ks[3], (DIM,), jnp.float32) * 0.02,
        bk=jax.random.normal(ks[4], (DIM,), jnp.float32) * 0.02,
        bv=jax.random.normal(ks[5], (DIM,), jnp.float32) * 0.02,
    )


if __name__ == "__main__":
    key = jax.random.PRNGKey(0)
    kx, kp = jax.random.split(key)
    params = init_params(kp)
    wqkv, bqkv = make_fused_params(params, DIM)    # one-time fused-weight prep
    x = jax.random.normal(kx, (B, C, DIM), jnp.float32)

    out = jax.block_until_ready(tablock_forward(x, wqkv, bqkv))
    ref = jax.block_until_ready(tablock_reference(x, params))

    assert out.shape == (B, C, DIM)
    assert bool(jnp.all(jnp.isfinite(out)))
    assert bool(jnp.allclose(out, ref, rtol=1e-3, atol=1e-3)), "mismatch vs reference"
    print("KERNEL_OK")
</pallas_src>

<mosaic_0001>
module attributes {stable_mosaic.version = 11 : i64} {
  func.func @_tablock_kernel(%arg0: i32, %arg1: memref<64x128xf32, #tpu.memory_space<vmem>>, %arg2: memref<128x64xf32, #tpu.memory_space<vmem>>, %arg3: memref<128x384xf32, #tpu.memory_space<vmem>>, %arg4: memref<1x384xf32, #tpu.memory_space<vmem>>, %arg5: memref<128x64xf32, #tpu.memory_space<vmem>>) attributes {dimension_semantics = [#tpu.dimension_semantics<parallel>], iteration_bounds = array<i64: 2>, scalar_prefetch = 0 : i64, scratch_operands = 0 : i64, tpu.core_type = #tpu.core_type<tc>, window_params = [{transform_indices = @transform_0, window_bounds = array<i64: 64, 128>}, {transform_indices = @transform_1, window_bounds = array<i64: 128, 64>}, {pipeline_mode = #tpu.pipeline_mode<synchronous>, transform_indices = @transform_2, window_bounds = array<i64: 128, 384>}, {pipeline_mode = #tpu.pipeline_mode<synchronous>, transform_indices = @transform_3, window_bounds = array<i64: 1, 384>}, {transform_indices = @transform_4, window_bounds = array<i64: 128, 64>}]} {
    %c0 = arith.constant 0 : index
    %c0_0 = arith.constant 0 : index
    %0 = vector.load %arg1[%c0, %c0_0] : memref<64x128xf32, #tpu.memory_space<vmem>>, vector<64x128xf32>
    %c0_1 = arith.constant 0 : index
    %c0_2 = arith.constant 0 : index
    %1 = vector.load %arg3[%c0_1, %c0_2] : memref<128x384xf32, #tpu.memory_space<vmem>>, vector<128x384xf32>
    %cst = arith.constant dense<0.000000e+00> : vector<64x384xf32>
    %2 = tpu.matmul %0, %1, %cst {dimension_numbers = #tpu.dot_dimension_numbers<[1], [0], [0], [1], [0, 0, 1, 1], [], []>} : vector<64x128xf32>, vector<128x384xf32>, vector<64x384xf32> -> vector<64x384xf32>
    %c0_3 = arith.constant 0 : index
    %c0_4 = arith.constant 0 : index
    %3 = vector.load %arg4[%c0_3, %c0_4] : memref<1x384xf32, #tpu.memory_space<vmem>>, vector<1x384xf32>
    %4 = vector.broadcast %3 : vector<1x384xf32> to vector<64x384xf32>
    %5 = arith.addf %2, %4 : vector<64x384xf32>
    %6 = tpu.iota {dimensions = array<i32: 0>} : vector<128x128xi32>
    %7 = tpu.iota {dimensions = array<i32: 1>} : vector<128x128xi32>
    %8 = arith.cmpi eq, %6, %7 : vector<128x128xi32>
    %9 = arith.extui %8 : vector<128x128xi1> to vector<128x128xi32>
    %10 = arith.sitofp %9 : vector<128x128xi32> to vector<128x128xf32>
    %11 = vector.extract_strided_slice %5 {offsets = [0, 0], sizes = [64, 128], strides = [1, 1]} : vector<64x384xf32> to vector<64x128xf32>
    %12 = vector.extract_strided_slice %5 {offsets = [0, 128], sizes = [64, 128], strides = [1, 1]} : vector<64x384xf32> to vector<64x128xf32>
    %13 = vector.extract_strided_slice %5 {offsets = [0, 256], sizes = [64, 128], strides = [1, 1]} : vector<64x384xf32> to vector<64x128xf32>
    %cst_5 = arith.constant dense<0.000000e+00> : vector<64x64xf32>
    %14 = tpu.matmul %11, %12, %cst_5 {dimension_numbers = #tpu.dot_dimension_numbers<[1], [1], [0], [0], [0, 0, 1, 0], [], []>} : vector<64x128xf32>, vector<64x128xf32>, vector<64x64xf32> -> vector<64x64xf32>
    %cst_6 = arith.constant dense<0xFF800000> : vector<64xf32>
    %15 = vector.multi_reduction <maximumf>, %14, %cst_6 [1] : vector<64x64xf32> to vector<64xf32>
    %16 = vector.shape_cast %15 : vector<64xf32> to vector<64x1xf32>
    %17 = vector.broadcast %16 : vector<64x1xf32> to vector<64x64xf32>
    %18 = arith.subf %14, %17 : vector<64x64xf32>
    %19 = math.exp %18 : vector<64x64xf32>
    %cst_7 = arith.constant dense<0.000000e+00> : vector<64xf32>
    %20 = vector.multi_reduction <add>, %19, %cst_7 [1] : vector<64x64xf32> to vector<64xf32>
    %21 = vector.shape_cast %20 : vector<64xf32> to vector<64x1xf32>
    %22 = tpu.reciprocal %21 {approx = true} : vector<64x1xf32> -> vector<64x1xf32>
    %23 = arith.mulf %21, %22 : vector<64x1xf32>
    %cst_8 = arith.constant 2.000000e+00 : f32
    %24 = vector.broadcast %cst_8 : f32 to vector<64x1xf32>
    %25 = arith.subf %24, %23 : vector<64x1xf32>
    %26 = arith.mulf %22, %25 : vector<64x1xf32>
    %27 = vector.broadcast %26 : vector<64x1xf32> to vector<64x64xf32>
    %28 = arith.mulf %19, %27 : vector<64x64xf32>
    %cst_9 = arith.constant dense<0.000000e+00> : vector<64x128xf32>
    %29 = tpu.matmul %28, %13, %cst_9 {dimension_numbers = #tpu.dot_dimension_numbers<[1], [0], [0], [1], [0, 0, 1, 1], [], []>} : vector<64x64xf32>, vector<64x128xf32>, vector<64x128xf32> -> vector<64x128xf32>
    %cst_10 = arith.constant dense<0.000000e+00> : vector<128x64xf32>
    %30 = tpu.matmul %10, %29, %cst_10 {dimension_numbers = #tpu.dot_dimension_numbers<[1], [1], [0], [0], [0, 0, 1, 0], [], []>} : vector<128x128xf32>, vector<64x128xf32>, vector<128x64xf32> -> vector<128x64xf32>
    %c0_11 = arith.constant 0 : index
    %c0_12 = arith.constant 0 : index
    %31 = vector.load %arg2[%c0_11, %c0_12] : memref<128x64xf32, #tpu.memory_space<vmem>>, vector<128x64xf32>
    %32 = arith.addf %30, %31 : vector<128x64xf32>
    %c0_13 = arith.constant 0 : index
    %c0_14 = arith.constant 0 : index
    %33 = vector.load %arg5[%c0_13, %c0_14] : memref<128x64xf32, #tpu.memory_space<vmem>>, vector<128x64xf32>
    tpu.vector_store %arg5[%c0_13, %c0_14], %32 {strides = array<i32>} : memref<128x64xf32, #tpu.memory_space<vmem>>, vector<128x64xf32>,
    return
  }
  func.func @transform_0(%arg0: i32) -> (i32, i32) {
    %c0_i32 = arith.constant 0 : i32
    %c0_i32_0 = arith.constant 0 : i32
    return %arg0, %c0_i32 : i32, i32
  }
  func.func @transform_1(%arg0: i32) -> (i32, i32) {
    %c0_i32 = arith.constant 0 : i32
    %c0_i32_0 = arith.constant 0 : i32
    return %arg0, %c0_i32 : i32, i32
  }
  func.func @transform_2(%arg0: i32) -> (i32, i32) {
    %c0_i32 = arith.constant 0 : i32
    %c0_i32_0 = arith.constant 0 : i32
    %c0_i32_1 = arith.constant 0 : i32
    return %c0_i32, %c0_i32_0 : i32, i32
  }
  func.func @transform_3(%arg0: i32) -> (i32, i32) {
    %c0_i32 = arith.constant 0 : i32
    %c0_i32_0 = arith.constant 0 : i32
    %c0_i32_1 = arith.constant 0 : i32
    return %c0_i32, %c0_i32_0 : i32, i32
  }
  func.func @transform_4(%arg0: i32) -> (i32, i32) {
    %c0_i32 = arith.constant 0 : i32
    %c0_i32_0 = arith.constant 0 : i32
    return %arg0, %c0_i32 : i32, i32
  }
}

</mosaic_0001>

<bundles_post_ra>
// kernel: tablock_forward.1
= control target key start
LH: loop header
LB: loop body
LE: loop exit
PB: predicated region body
PF: predicated region fallthrough
CT: control target
= control target key end

     0   :  { %9 = vsyncpa [#allocation3], 0  ;;  %s1598_s15 = smov 0   ;;  %s1867_s0 = inlined_call_operand.vmem [shape: f32[128,128], index: 0, kind: input, shape index: {}]   ;;  %s1868_s1 = inlined_call_operand.vmem [shape: f32[256,64], index: 1, kind: input, shape index: {}]   ;;  %s1869_s2 = inlined_call_operand.hbm [shape: f32[128,384], index: 2, kind: input, shape index: {}]   ;;  %s1870_s3 = inlined_call_operand.vmem [shape: f32[1,384], index: 3, kind: input, shape index: {}]   ;;  %s1871_s4 = inlined_call_operand.vmem [shape: f32[256,64], index: 4, kind: output, shape index: {}]  }
   0x1 LB: > { %s1604_s16 = sadd.s32 4294967295, %s1566_s15   ;;  %p1202_p0 = scmp.ge.s32.totalorder %s1566_s15, 1  ;;  %s1566_s15 = sphi %s1598_s15, %s15_s15  }
   0x2   : > { %p140_p1 = scmp.lt.s32.totalorder %s1566_s15, 3  ;;  %s1568_s17 = smov [#allocation2]  }
   0x3   : > { %s152_s18 = sshll.u32 %s1568_s17, 4  ;;  %p1483_p3 = scmp.eq.s32.totalorder %s1604_s16, 0  ;;  %s153_s18 = int_to_ptr.vmem [resolvable:$true] %s152_s18 }
   0x4   : > { %p1608_p2 = pnand %p1202_p0, %p140_p1  ;;  %s1541_s20 = scalar_lea.vmem %s153_s18, 6144 }
   0x5   : > { %p1542_p7 = scmp.ne.s32.totalorder %s153_s18, %s1541_s20  ;;  %p1549_p10 = scmp.lt.s32.totalorder %s153_s18, %s153_s18 }
   0x6   : > { %p1479_p4 = pneg %p1608_p2  ;;  %p1550_p11 = scmp.lt.s32.totalorder %s1541_s20, %s1541_s20 }
   0x8   : > { %p1480_p5 = pnand %p1483_p3, %p1479_p4  ;;  %p1551_p12 = por %p1550_p11, %p1549_p10 }
   0xa   : > { %p1532_p6 = pneg %p1480_p5 }
   0xc   : > { %p1544_p8 = pnand %p1542_p7, %p1532_p6 }
   0xe   : > { %p1545_p9 = pneg %p1544_p8 }
  0x10   : > { %p1552_p13 = pnand %p1551_p12, %p1545_p9 }
  0x12   : > { %1555 = shalt.err (!%p1552_p13)
}
  0x13   : > { %s1569_s21 = smov 384   ;;  %s1570_s22 = smov 24  }
  0x14   : > { %1482 = dma.hbm_to_vmem [thread:$0]  (!%p1480_p5), %s1869_s2, 6144, %s153_s18, [#allocation3], %s1569_s21, %s1569_s21, %s1570_s22  }
  0x15   : > { %189 = sbr.rel (%p1608_p2) target bundleno = 1297 (0x511), region = 36 }
  0x1a   : > { %1561 = dma.done.wait (%p1483_p3), [#allocation3], 6144  }
  0x1b   : > { %1563 = vsyncadd (%p1483_p3), [#allocation3], 4294961152  ;;  %s1207_s25 = sshll.u32 %s1604_s16, 3  ;;  %v1571_v0 = vmov 0.0   ;;  %v292_v1 = vld [vmem:[#allocation2 + $0x170] sm:$0xff]  ;;  %v291_v2 = vld [vmem:[#allocation2 + $0x168] sm:$0xff]  ;;  %v296_v41 = vlaneseq }
  0x1c   : > { %375 = vmatprep.mubr.f32.mxu0 %v1571_v0  ;;  %p221_p0 = scmp.lt.s32.totalorder %s1207_s25, 15  ;;  %v289_v3 = vld [vmem:[#allocation2 + $0x158] sm:$0xff]  ;;  %311 = vmatprep.subr.mxu0 %v292_v1  ;;  %v288_v4 = vld [vmem:[#allocation2 + $0x150] sm:$0xff]  ;;  %v286_v5 = vld [vmem:[#allocation2 + $0x140] sm:$0xff]  ;;  %vm701_vm0 = vcmask 523264   ;;  %s1209_s6 = sshll.u32 %s1604_s16, 4 }
  0x1d   : > { %312 = vmatpush1.msra.mxu0 %v291_v2  ;;  %v285_v6 = vld [vmem:[#allocation2 + $0x138] sm:$0xff]  ;;  %v283_v7 = vld [vmem:[#allocation2 + $0x128] sm:$0xff]  ;;  %v282_v8 = vld [vmem:[#allocation2 + $0x120] sm:$0xff]  ;;  %v1670_v42 = vshrl.u32 %v296_v41, 7  ;;  %p227_p1 = scmp.lt.s32.totalorder %s1209_s6, 31 }
  0x1e   : > { %s1874_s25 = smov (!%p221_p0, %s1207_s25), 15  ;;  %313 = vmatprep.subr.mxu0 %v289_v3  ;;  %v280_v9 = vld [vmem:[#allocation2 + $0x110] sm:$0xff]  ;;  %v279_v10 = vld [vmem:[#allocation2 + $0x108] sm:$0xff]  ;;  %v277_v11 = vld [vmem:[#allocation2 + $0xf8] sm:$0xff] }
  0x1f   : > { %314 = vmatpush1.msra.mxu0 %v288_v4  ;;  %s1208_s26 = sshll.u32 %s1874_s25, 3  ;;  %v276_v12 = vld [vmem:[#allocation2 + $0xf0] sm:$0xff]  ;;  %v274_v13 = vld [vmem:[#allocation2 + $0xe0] sm:$0xff]  ;;  %v273_v15 = vld [vmem:[#allocation2 + $0xd8] sm:$0xff]  ;;  %v298_v43 = vsub.s32 0, %v1670_v42  ;;  %v302_v60 = vsub.s32 1, %v1670_v42 }
  0x20   : > { %315 = vmatprep.subr.mxu0 %v286_v5  ;;  %s1631_s29 = scalar_lea.vmem %s1867_s0, %s1208_s26  ;;  %v271_v16 = vld [vmem:[#allocation2 + $0xc8] sm:$0xff]  ;;  %v270_v17 = vld [vmem:[#allocation2 + $0xc0] sm:$0xff]  ;;  %v268_v18 = vld [vmem:[#allocation2 + $0xb0] sm:$0xff]  ;;  %s1876_s6 = smov (!%p227_p1, %s1209_s6), 31 }
  0x21   : > { %316 = vmatpush1.msra.mxu0 %v285_v6  ;;  %v238_v14 = vld [vmem:[%s1631_s29] sm:$0xff]  ;;  %v267_v19 = vld [vmem:[#allocation2 + $0xa8] sm:$0xff]  ;;  %v265_v20 = vld [vmem:[#allocation2 + $0x98] sm:$0xff]  ;;  %s1210_s7 = sshll.u32 %s1876_s6, 3 }
  0x22   : > { %317 = vmatprep.subr.mxu0 %v283_v7  ;;  %1367 = vmatprep.mubr.f32.mxu1 %v238_v14  ;;  %v264_v21 = vld [vmem:[#allocation2 + $0x90] sm:$0xff]  ;;  %v262_v22 = vld [vmem:[#allocation2 + $0x80] sm:$0xff]  ;;  %v261_v23 = vld [vmem:[#allocation2 + $0x78] sm:$0xff]  ;;  %s1809_s10 = scalar_lea.vmem %s1868_s1, %s1210_s7  ;;  %s1815_s13 = scalar_lea.vmem %s1871_s4, %s1210_s7 }
  0x23   : > { %318 = vmatpush1.msra.mxu0 %v282_v8  ;;  %v259_v24 = vld [vmem:[#allocation2 + $0x68] sm:$0xff]  ;;  %v258_v25 = vld [vmem:[#allocation2 + $0x60] sm:$0xff]  ;;  %v256_v26 = vld [vmem:[#allocation2 + $0x50] sm:$0xff] }
  0x24   : > { %319 = vmatprep.subr.mxu0 %v280_v9  ;;  %v255_v27 = vld [vmem:[#allocation2 + $0x48] sm:$0xff]  ;;  %v253_v28 = vld [vmem:[#allocation2 + $0x38] sm:$0xff]  ;;  %v252_v29 = vld [vmem:[#allocation2 + $0x30] sm:$0xff] }
  0x25   : > { %320 = vmatpush1.msra.mxu0 %v279_v10  ;;  %v250_v30 = vld [vmem:[#allocation2 + $0x20] sm:$0xff]  ;;  %v249_v31 = vld [vmem:[#allocation2 + $0x18] sm:$0xff]  ;;  %v247_v32 = vld [vmem:[#allocation2 + $0x8] sm:$0xff] }
  0x26   : > { %321 = vmatprep.subr.mxu0 %v277_v11  ;;  %v246_v33 = vld [vmem:[#allocation2] sm:$0xff]  ;;  %v1636_v34 = vld [vmem:[%s1631_s29 + $0x8] sm:$0xff]  ;;  %v1641_v35 = vld [vmem:[%s1631_s29 + $0x10] sm:$0xff] }
  0x27   : > { %322 = vmatpush1.msra.mxu0 %v276_v12  ;;  %v1646_v36 = vld [vmem:[%s1631_s29 + $0x18] sm:$0xff]  ;;  %v1651_v37 = vld [vmem:[%s1631_s29 + $0x20] sm:$0xff]  ;;  %v1656_v38 = vld [vmem:[%s1631_s29 + $0x28] sm:$0xff] }
  0x28   : > { %323 = vmatprep.subr.mxu0 %v274_v13  ;;  %v1661_v39 = vld [vmem:[%s1631_s29 + $0x30] sm:$0xff]  ;;  %v1666_v40 = vld [vmem:[%s1631_s29 + $0x38] sm:$0xff]  ;;  %v1676_v44 = vld [vmem:[%s1870_s3] sm:$0x7] }
  0x29   : > { %324 = vmatpush1.msra.mxu0 %v273_v15  ;;  %v299_v45 = vrot.slane %v1676_v44, %v298_v43  ;;  %v303_v63 = vrot.slane %v1676_v44, %v302_v60 }
  0x2a   : > { %325 = vmatprep.subr.mxu0 %v271_v16  ;;  %v293_v16 = vld [vmem:[#allocation2 + $0x178] sm:$0xff] }
  0x2b   : > { %326 = vmatpush1.msra.mxu0 %v270_v17  ;;  %v290_v17 = vld [vmem:[#allocation2 + $0x160] sm:$0xff]  ;;  %1335 = vmatprep.subr.mxu1 %v293_v16 }
  0x2c   : > { %327 = vmatprep.subr.mxu0 %v268_v18  ;;  %1336 = vmatpush3.msra.mxu1 %v293_v16  ;;  %v287_v18 = vld [vmem:[#allocation2 + $0x148] sm:$0xff] }
  0x2d   : > { %328 = vmatpush1.msra.mxu0 %v267_v19  ;;  %1337 = vmatprep.subr.mxu1 %v290_v17  ;;  %v284_v19 = vld [vmem:[#allocation2 + $0x130] sm:$0xff] }
  0x2e   : > { %329 = vmatprep.subr.mxu0 %v265_v20  ;;  %1338 = vmatpush3.msra.mxu1 %v290_v17  ;;  %v281_v20 = vld [vmem:[#allocation2 + $0x118] sm:$0xff] }
  0x2f   : > { %330 = vmatpush1.msra.mxu0 %v264_v21  ;;  %1339 = vmatprep.subr.mxu1 %v287_v18  ;;  %v278_v21 = vld [vmem:[#allocation2 + $0x100] sm:$0xff] }
  0x30   : > { %331 = vmatprep.subr.mxu0 %v262_v22  ;;  %1340 = vmatpush3.msra.mxu1 %v287_v18  ;;  %v275_v22 = vld [vmem:[#allocation2 + $0xe8] sm:$0xff] }
  0x31   : > { %332 = vmatpush1.msra.mxu0 %v261_v23  ;;  %1341 = vmatprep.subr.mxu1 %v284_v19  ;;  %v272_v23 = vld [vmem:[#allocation2 + $0xd0] sm:$0xff] }
  0x32   : > { %333 = vmatprep.subr.mxu0 %v259_v24  ;;  %1342 = vmatpush3.msra.mxu1 %v284_v19  ;;  %v269_v24 = vld [vmem:[#allocation2 + $0xb8] sm:$0xff] }
  0x33   : > { %334 = vmatpush1.msra.mxu0 %v258_v25  ;;  %1343 = vmatprep.subr.mxu1 %v281_v20  ;;  %v266_v25 = vld [vmem:[#allocation2 + $0xa0] sm:$0xff] }
  0x34   : > { %335 = vmatprep.subr.mxu0 %v256_v26  ;;  %1344 = vmatpush3.msra.mxu1 %v281_v20  ;;  %v263_v26 = vld [vmem:[#allocation2 + $0x88] sm:$0xff] }
  0x35   : > { %336 = vmatpush1.msra.mxu0 %v255_v27  ;;  %1345 = vmatprep.subr.mxu1 %v278_v21  ;;  %v260_v27 = vld [vmem:[#allocation2 + $0x70] sm:$0xff] }
  0x36   : > { %337 = vmatprep.subr.mxu0 %v253_v28  ;;  %1346 = vmatpush3.msra.mxu1 %v278_v21  ;;  %v257_v28 = vld [vmem:[#allocation2 + $0x58] sm:$0xff] }
  0x37   : > { %338 = vmatpush1.msra.mxu0 %v252_v29  ;;  %1347 = vmatprep.subr.mxu1 %v275_v22  ;;  %v254_v29 = vld [vmem:[#allocation2 + $0x40] sm:$0xff] }
  0x38   : > { %339 = vmatprep.subr.mxu0 %v250_v30  ;;  %1348 = vmatpush3.msra.mxu1 %v275_v22  ;;  %v251_v30 = vld [vmem:[#allocation2 + $0x28] sm:$0xff] }
  0x39   : > { %340 = vmatpush1.msra.mxu0 %v249_v31  ;;  %1349 = vmatprep.subr.mxu1 %v272_v23  ;;  %v248_v31 = vld [vmem:[#allocation2 + $0x10] sm:$0xff] }
  0x3a   : > { %341 = vmatprep.subr.mxu0 %v247_v32  ;;  %1350 = vmatpush3.msra.mxu1 %v272_v23 }
  0x3b   : > { %342 = vmatpush1.msra.mxu0 %v246_v33  ;;  %1351 = vmatprep.subr.mxu1 %v269_v24 }
  0x3c   : > { %376 = vmatmul.mubr.f32.vlgmr.msra.gmra.mxu0 %v238_v14  ;;  %1352 = vmatpush3.msra.mxu1 %v269_v24 }
  0x3d   : > { %381 = vmatprep.mubr.f32.mxu0 %v1571_v0  ;;  %1353 = vmatprep.subr.mxu1 %v266_v25 }
  0x3e   : > { %1354 = vmatpush3.msra.mxu1 %v266_v25 }
  0x3f   : > { %1355 = vmatprep.subr.mxu1 %v263_v26 }
  0x40   : > { %382 = vmatmul.mubr.f32.gmra.mxu0 %v1636_v34  ;;  %1356 = vmatpush3.msra.mxu1 %v263_v26 }
  0x41   : > { %387 = vmatprep.mubr.f32.mxu0 %v1571_v0  ;;  %1357 = vmatprep.subr.mxu1 %v260_v27 }
  0x42   : > { %1358 = vmatpush3.msra.mxu1 %v260_v27 }
  0x43   : > { %1359 = vmatprep.subr.mxu1 %v257_v28 }
  0x44   : > { %388 = vmatmul.mubr.f32.gmra.mxu0 %v1641_v35  ;;  %1360 = vmatpush3.msra.mxu1 %v257_v28 }
  0x45   : > { %393 = vmatprep.mubr.f32.mxu0 %v1571_v0  ;;  %1361 = vmatprep.subr.mxu1 %v254_v29 }
  0x46   : > { %1362 = vmatpush3.msra.mxu1 %v254_v29 }
  0x47   : > { %1363 = vmatprep.subr.mxu1 %v251_v30 }
  0x48   : > { %394 = vmatmul.mubr.f32.gmra.mxu0 %v1646_v36  ;;  %1364 = vmatpush3.msra.mxu1 %v251_v30 }
  0x49   : > { %399 = vmatprep.mubr.f32.mxu0 %v1571_v0  ;;  %1365 = vmatprep.subr.mxu1 %v248_v31 }
  0x4a   : > { %1366 = vmatpush3.msra.mxu1 %v248_v31 }
  0x4b   : > { %1368 = vmatmul.mubr.f32.vlgmr.msra.gmra.mxu1 %v1636_v34 }
  0x4c   : > { %400 = vmatmul.mubr.f32.gmra.mxu0 %v1651_v37  ;;  %1370 = vmatprep.mubr.f32.mxu1 %v1641_v35 }
  0x4d   : > { %405 = vmatprep.mubr.f32.mxu0 %v1571_v0 }
  0x4f   : > { %1371 = vmatmul.mubr.f32.gmra.mxu1 %v1646_v36 }
  0x50   : > { %406 = vmatmul.mubr.f32.gmra.mxu0 %v1656_v38  ;;  %1373 = vmatprep.mubr.f32.mxu1 %v1651_v37 }
  0x51   : > { %411 = vmatprep.mubr.f32.mxu0 %v1571_v0 }
  0x53   : > { %1374 = vmatmul.mubr.f32.gmra.mxu1 %v1656_v38 }
  0x54   : > { %412 = vmatmul.mubr.f32.gmra.mxu0 %v1661_v39  ;;  %1376 = vmatprep.mubr.f32.mxu1 %v1661_v39 }
  0x55   : > { %417 = vmatprep.mubr.f32.mxu0 %v1571_v0 }
  0x57   : > { %1377 = vmatmul.mubr.f32.gmra.mxu1 %v1666_v40 }
  0x58   : > { %418 = vmatmul.mubr.f32.gmra.mxu0 %v1666_v40 }
  0xfc   : > { %v377_v46 = vpop.f32.mrf.mxu0 }
  0xfd   : > { %v378_v47 = vadd.f32 %v377_v46, %v299_v45 }
  0xfe   : > { %v379_v48 = vpop.f32.mrf.mxu0 }
  0xff   : > { %1395 = vmatprep.mubr.f32.mxu0 %v378_v47  ;;  %v380_v8 = vadd.f32 %v379_v48, %v303_v63 }
 0x100   : > { %v383_v49 = vpop.f32.mrf.mxu0 }
 0x101   : > { %v384_v9 = vadd.f32 %v383_v49, %v299_v45 }
 0x102   : > { %v385_v50 = vpop.f32.mrf.mxu0 }
 0x103   : > { %v386_v7 = vadd.f32 %v385_v50, %v303_v63 }
 0x104   : > { %v389_v51 = vpop.f32.mrf.mxu0 }
 0x105   : > { %v390_v10 = vadd.f32 %v389_v51, %v299_v45 }
 0x106   : > { %v391_v52 = vpop.f32.mrf.mxu0 }
 0x107   : > { %v392_v6 = vadd.f32 %v391_v52, %v303_v63 }
 0x108   : > { %v395_v53 = vpop.f32.mrf.mxu0 }
 0x109   : > { %v396_v11 = vadd.f32 %v395_v53, %v299_v45 }
 0x10a   : > { %v397_v54 = vpop.f32.mrf.mxu0 }
 0x10b   : > { %v398_v5 = vadd.f32 %v397_v54, %v303_v63  ;;  %v1369_v51 = vpop.f32.mrf.mxu1  ;;  %v306_v54 = vsub.s32 2, %v1670_v42 }
 0x10c   : > { %v401_v55 = vpop.f32.mrf.mxu0 }
 0x10d   : > { %v402_v12 = vadd.f32 %v401_v55, %v299_v45  ;;  %v490_v52 = vpop.f32.mrf.mxu1 }
 0x10e   : > { %v403_v56 = vpop.f32.mrf.mxu0 }
 0x10f   : > { %v404_v4 = vadd.f32 %v403_v56, %v303_v63  ;;  %v1372_v53 = vpop.f32.mrf.mxu1 }
 0x110   : > { %v407_v57 = vpop.f32.mrf.mxu0 }
 0x111   : > { %v408_v13 = vadd.f32 %v407_v57, %v299_v45  ;;  %v500_v55 = vpop.f32.mrf.mxu1  ;;  %v307_v57 = vrot.slane %v1676_v44, %v306_v54 }
 0x112   : > { %v409_v58 = vpop.f32.mrf.mxu0 }
 0x113   : > { %v410_v3 = vadd.f32 %v409_v58, %v303_v63  ;;  %v1375_v56 = vpop.f32.mrf.mxu1 }
 0x114   : > { %v413_v59 = vpop.f32.mrf.mxu0 }
 0x115   : > { %v414_v14 = vadd.f32 %v413_v59, %v299_v45  ;;  %v510_v58 = vpop.f32.mrf.mxu1 }
 0x116   : > { %v415_v61 = vpop.f32.mrf.mxu0 }
 0x117   : > { %v416_v2 = vadd.f32 %v415_v61, %v303_v63  ;;  %v1378_v59 = vpop.f32.mrf.mxu1 }
 0x118   : > { %v419_v62 = vpop.f32.mrf.mxu0  ;;  %v526_v60 = vadd.f32 %v1378_v59, %v307_v57 }
 0x119   : > { %v420_v15 = vadd.f32 %v419_v62, %v299_v45  ;;  %v520_v61 = vpop.f32.mrf.mxu1  ;;  %v516_v62 = vadd.f32 %v1375_v56, %v307_v57 }
 0x11a   : > { %v421_v0 = vpop.f32.mrf.mxu0 }
 0x11b   : > { %v422_v1 = vadd.f32 %v421_v0, %v303_v63  ;;  %v521_v63 = vadd.f32 %v520_v61, %v307_v57  ;;  %v511_v0 = vadd.f32 %v510_v58, %v307_v57 }
 0x11d   : > { %1379 = vmatprep.subr.mxu0 %v422_v1 }
 0x11e   : > { %1380 = vmatpush3.xpose.msra.mxu0 %v422_v1  ;;  %v506_v1 = vadd.f32 %v1372_v53, %v307_v57 }
 0x11f   : > { %1381 = vmatprep.subr.mxu0 %v416_v2 }
 0x122   : > { %1382 = vmatpush3.xpose.msra.mxu0 %v416_v2  ;;  %v501_v2 = vadd.f32 %v500_v55, %v307_v57 }
 0x123   : > { %1383 = vmatprep.subr.mxu0 %v410_v3 }
 0x126   : > { %1384 = vmatpush3.xpose.msra.mxu0 %v410_v3  ;;  %v496_v3 = vadd.f32 %v1369_v51, %v307_v57 }
 0x127   : > { %1385 = vmatprep.subr.mxu0 %v404_v4 }
 0x12a   : > { %1386 = vmatpush3.xpose.msra.mxu0 %v404_v4 }
 0x12b   : > { %1387 = vmatprep.subr.mxu0 %v398_v5 }
 0x12e   : > { %1388 = vmatpush3.xpose.msra.mxu0 %v398_v5  ;;  %v491_v5 = vadd.f32 %v490_v52, %v307_v57 }
 0x12f   : > { %1389 = vmatprep.subr.mxu0 %v392_v6 }
 0x132   : > { %1390 = vmatpush3.xpose.msra.mxu0 %v392_v6 }
 0x133   : > { %1391 = vmatprep.subr.mxu0 %v386_v7 }
 0x136   : > { %1392 = vmatpush3.xpose.msra.mxu0 %v386_v7 }
 0x137   : > { %1393 = vmatprep.subr.mxu0 %v380_v8 }
 0x13a   : > { %1394 = vmatpush3.xpose.msra.mxu0 %v380_v8 }
 0x13b   : > { %1407 = vmatprep.subr.mxu0 %v526_v60 }
 0x13d   : > { %1396 = vmatmul.mubr.f32.vlgmr.msra.gmra.mxu0 %v384_v9 }
 0x13e   : > { %1398 = vmatprep.mubr.f32.mxu0 %v390_v10  ;;  %1408 = vmatpush3.msra.mxu0 %v526_v60 }
 0x13f   : > { %1409 = vmatprep.subr.mxu0 %v521_v63 }
 0x140   : > { %1410 = vmatpush3.msra.mxu0 %v521_v63 }
 0x141   : > { %1399 = vmatmul.mubr.f32.gmra.mxu0 %v396_v11  ;;  %1411 = vmatprep.subr.mxu0 %v516_v62 }
 0x142   : > { %1401 = vmatprep.mubr.f32.mxu0 %v402_v12  ;;  %1412 = vmatpush3.msra.mxu0 %v516_v62 }
 0x143   : > { %1413 = vmatprep.subr.mxu0 %v511_v0 }
 0x144   : > { %1414 = vmatpush3.msra.mxu0 %v511_v0 }
 0x145   : > { %1402 = vmatmul.mubr.f32.gmra.mxu0 %v408_v13  ;;  %1415 = vmatprep.subr.mxu0 %v506_v1 }
 0x146   : > { %1404 = vmatprep.mubr.f32.mxu0 %v414_v14  ;;  %1416 = vmatpush3.msra.mxu0 %v506_v1 }
 0x147   : > { %1417 = vmatprep.subr.mxu0 %v501_v2 }
 0x148   : > { %1418 = vmatpush3.msra.mxu0 %v501_v2 }
 0x149   : > { %1405 = vmatmul.mubr.f32.gmra.mxu0 %v420_v15  ;;  %1419 = vmatprep.subr.mxu0 %v496_v3 }
 0x14a   : > { %1420 = vmatpush3.msra.mxu0 %v496_v3 }
 0x14b   : > { %1421 = vmatprep.subr.mxu0 %v491_v5 }
 0x14c   : > { %1422 = vmatpush3.msra.mxu0 %v491_v5 }
 0x1fd   : > { %v1688_v32 = vpop.f32.mrf.mxu0 }
 0x1fe   : > { %v705_v36 = vsel %vm701_vm0, %v1688_v32, -inf }
 0x1ff   : > { %v662_v33 = vpop.f32.mrf.mxu0 }
 0x200   : > { %v702_v43 = vsel %vm701_vm0, %v662_v33, -inf }
 0x201   : > { %703 = vmax.xlane.f32.xlu0 %v702_v43  ;;  %v1691_v34 = vpop.f32.mrf.mxu0 }
 0x202   : > { %v711_v40 = vsel %vm701_vm0, %v1691_v34, -inf }
 0x203   : > { %v672_v35 = vpop.f32.mrf.mxu0 }
 0x204   : > { %v708_v37 = vsel %vm701_vm0, %v672_v35, -inf }
 0x205   : > { %706 = vmax.xlane.f32.xlu0 %v705_v36  ;;  %709 = vmax.xlane.f32.xlu1 %v708_v37  ;;  %v1696_v38 = vpop.f32.mrf.mxu0 }
 0x206   : > { %v717_v48 = vsel %vm701_vm0, %v1696_v38, -inf }
 0x207   : > { %v1698_v39 = vpop.f32.mrf.mxu0 }
 0x208   : > { %v714_v45 = vsel %vm701_vm0, %v1698_v39, -inf }
 0x209   : > { %712 = vmax.xlane.f32.xlu1 %v711_v40  ;;  %715 = vmax.xlane.f32.xlu0 %v714_v45  ;;  %v1704_v46 = vpop.f32.mrf.mxu0 }
 0x20a   : > { %v723_v50 = vsel %vm701_vm0, %v1704_v46, -inf }
 0x20b   : > { %v1706_v47 = vpop.f32.mrf.mxu0 }
 0x20c   : > { %v720_v49 = vsel %vm701_vm0, %v1706_v47, -inf }
 0x20d   : > { %718 = vmax.xlane.f32.xlu1 %v717_v48  ;;  %721 = vmax.xlane.f32.xlu0 %v720_v49 }
 0x211   : > { %724 = vmax.xlane.f32.xlu1 %v723_v50 }
 0x28a   : > { %v704_v44 = vpop.xlane.xlu0 %703 }
 0x28b   : > { %v726_v4 = vsub.f32 %v662_v33, %v704_v44 }
 0x28d   : > { %v734_v6 = vmul.f32 1.442695, %v726_v4 }
 0x28e   : > { %v707_v7 = vpop.xlane.xlu0 %706  ;;  %v710_v8 = vpop.xlane.xlu1 %709 }
 0x28f   : > { %1498 = vpow2.f32 %v734_v6  ;;  %v727_v9 = vsub.f32 %v1688_v32, %v707_v7  ;;  %v728_v10 = vsub.f32 %v672_v35, %v710_v8 }
 0x291   : > { %v736_v11 = vmul.f32 1.442695, %v727_v9  ;;  %v738_v12 = vmul.f32 1.442695, %v728_v10 }
 0x292   : > { %v713_v13 = vpop.xlane.xlu1 %712  ;;  %v716_v14 = vpop.xlane.xlu0 %715 }
 0x293   : > { %1500 = vpow2.f32 %v736_v11  ;;  %v729_v15 = vsub.f32 %v1691_v34, %v713_v13  ;;  %v730_v16 = vsub.f32 %v1698_v39, %v716_v14 }
 0x294   : > { %1502 = vpow2.f32 %v738_v12 }
 0x295   : > { %v740_v17 = vmul.f32 1.442695, %v729_v15  ;;  %v742_v18 = vmul.f32 1.442695, %v730_v16 }
 0x296   : > { %v719_v19 = vpop.xlane.xlu1 %718  ;;  %v722_v20 = vpop.xlane.xlu0 %721 }
 0x297   : > { %1504 = vpow2.f32 %v740_v17  ;;  %v731_v21 = vsub.f32 %v1696_v38, %v719_v19  ;;  %v732_v22 = vsub.f32 %v1706_v47, %v722_v20 }
 0x298   : > { %1506 = vpow2.f32 %v742_v18 }
 0x299   : > { %v744_v23 = vmul.f32 1.442695, %v731_v21  ;;  %v746_v24 = vmul.f32 1.442695, %v732_v22 }
 0x29a   : > { %v725_v25 = vpop.xlane.xlu1 %724 }
 0x29b   : > { %1508 = vpow2.f32 %v744_v23  ;;  %v733_v26 = vsub.f32 %v1704_v46, %v725_v25 }
 0x29c   : > { %v1499_v27 = vpop.eup %1498  ;;  %1510 = vpow2.f32 %v746_v24 }
 0x29d   : > { %v748_v28 = vmul.f32 1.442695, %v733_v26  ;;  %v750_v29 = vsel %vm701_vm0, %v1499_v27, 0.0 }
 0x29e   : > { %751 = vadd.xlane.f32.xlu0 %v750_v29 }
 0x29f   : > { %1512 = vpow2.f32 %v748_v28 }
 0x2a0   : > { %v1501_v30 = vpop.eup %1500 }
 0x2a1   : > { %v1503_v31 = vpop.eup %1502  ;;  %v753_v32 = vsel %vm701_vm0, %v1501_v30, 0.0 }
 0x2a2   : > { %754 = vadd.xlane.f32.xlu1 %v753_v32  ;;  %v756_v33 = vsel %vm701_vm0, %v1503_v31, 0.0 }
 0x2a3   : > { %757 = vadd.xlane.f32.xlu0 %v756_v33 }
 0x2a4   : > { %v1505_v43 = vpop.eup %1504 }
 0x2a5   : > { %v1725_v34 = vpop.eup %1506  ;;  %v759_v35 = vsel %vm701_vm0, %v1505_v43, 0.0 }
 0x2a6   : > { %760 = vadd.xlane.f32.xlu1 %v759_v35  ;;  %v762_v36 = vsel %vm701_vm0, %v1725_v34, 0.0 }
 0x2a7   : > { %763 = vadd.xlane.f32.xlu0 %v762_v36 }
 0x2a8   : > { %v1730_v37 = vpop.eup %1508 }
 0x2a9   : > { %v1732_v38 = vpop.eup %1510  ;;  %v765_v39 = vsel %vm701_vm0, %v1730_v37, 0.0 }
 0x2aa   : > { %766 = vadd.xlane.f32.xlu1 %v765_v39  ;;  %v768_v40 = vsel %vm701_vm0, %v1732_v38, 0.0  ;;  %v532_v39 = vadd.s32 16, %v1670_v42 }
 0x2ab   : > { %769 = vadd.xlane.f32.xlu0 %v768_v40  ;;  %v533_v40 = vadd.s32 24, %v1670_v42 }
 0x2ac   : > { %v1738_v45 = vpop.eup %1512 }
 0x2ad   : > { %v771_v46 = vsel %vm701_vm0, %v1738_v45, 0.0 }
 0x2ae   : > { %772 = vadd.xlane.f32.xlu1 %v771_v46  ;;  %v535_v46 = vadd.s32 40, %v1670_v42 }
 0x327   : > { %v752_v47 = vpop.xlane.xlu0 %751 }
 0x328   : > { %1514 = vrcp.f32 %v752_v47 }
 0x32b   : > { %v755_v48 = vpop.xlane.xlu1 %754 }
 0x32c   : > { %1516 = vrcp.f32 %v755_v48  ;;  %v758_v49 = vpop.xlane.xlu0 %757 }
 0x32d   : > { %1518 = vrcp.f32 %v758_v49 }
 0x32f   : > { %v761_v50 = vpop.xlane.xlu1 %760 }
 0x330   : > { %1520 = vrcp.f32 %v761_v50  ;;  %v764_v51 = vpop.xlane.xlu0 %763 }
 0x331   : > { %1522 = vrcp.f32 %v764_v51 }
 0x333   : > { %v767_v52 = vpop.xlane.xlu1 %766 }
 0x334   : > { %1524 = vrcp.f32 %v767_v52  ;;  %v770_v53 = vpop.xlane.xlu0 %769 }
 0x335   : > { %v1515_v54 = vpop.eup %1514  ;;  %1526 = vrcp.f32 %v770_v53 }
 0x336   : > { %v782_v55 = vmul.f32 %v1515_v54, %v752_v47  ;;  %v536_v47 = vadd.s32 48, %v1670_v42 }
 0x337   : > { %v773_v56 = vpop.xlane.xlu1 %772 }
 0x338   : > { %v790_v57 = vsub.f32 2.0, %v782_v55  ;;  %1528 = vrcp.f32 %v773_v56  ;;  %v544_v55 = vadd.s32 112, %v1670_v42 }
 0x339   : > { %v1517_v58 = vpop.eup %1516 }
 0x33a   : > { %v1519_v59 = vpop.eup %1518  ;;  %v798_v60 = vmul.f32 %v1515_v54, %v790_v57  ;;  %v783_v61 = vmul.f32 %v1517_v58, %v755_v48  ;;  %v537_v48 = vadd.s32 56, %v1670_v42  ;;  %v543_v54 = vadd.s32 104, %v1670_v42 }
 0x33b   : > { %v784_v62 = vmul.f32 %v1519_v59, %v758_v49  ;;  %v538_v49 = vadd.s32 64, %v1670_v42 }
 0x33c   : > { %v806_v63 = vmul.f32 %v1499_v27, %v798_v60  ;;  %v791_v0 = vsub.f32 2.0, %v783_v61  ;;  %v946_v61 = vld [vmem:[%s1809_s10 + $0x18] sm:$0xff] }
 0x33d   : > { %v1521_v1 = vpop.eup %1520  ;;  %v792_v2 = vsub.f32 2.0, %v784_v62 }
 0x33e   : > { %v1523_v3 = vpop.eup %1522  ;;  %v799_v44 = vmul.f32 %v1517_v58, %v791_v0  ;;  %v785_v4 = vmul.f32 %v1521_v1, %v761_v50  ;;  %1423 = vmatprep.mubr.msk.f32.mxu0 %vm701_vm0, %v806_v63  ;;  %v539_v50 = vadd.s32 72, %v1670_v42  ;;  %v943_v58 = vld [vmem:[%s1809_s10] sm:$0xff]  ;;  %v945_v0 = vld [vmem:[%s1809_s10 + $0x10] sm:$0xff] }
 0x33f   : > { %v800_v5 = vmul.f32 %v1519_v59, %v792_v2  ;;  %v786_v6 = vmul.f32 %v1523_v3, %v764_v51  ;;  %v540_v51 = vadd.s32 80, %v1670_v42 }
 0x340   : > { %v807_v7 = vmul.f32 %v1501_v30, %v799_v44  ;;  %v793_v8 = vsub.f32 2.0, %v785_v4  ;;  %v1755_v30 = vand.u32 127, %v296_v41  ;;  %v531_v41 = vadd.s32 8, %v1670_v42 }
 0x341   : > { %v1525_v9 = vpop.eup %1524  ;;  %v808_v10 = vmul.f32 %v1503_v31, %v800_v5  ;;  %v794_v11 = vsub.f32 2.0, %v786_v6  ;;  %v1572_v31 = vmov 1.0   ;;  %v947_v5 = vld [vmem:[%s1809_s10 + $0x20] sm:$0xff] }
 0x342   : > { %v1527_v12 = vpop.eup %1526  ;;  %v801_v13 = vmul.f32 %v1521_v1, %v793_v8  ;;  %v787_v14 = vmul.f32 %v1525_v9, %v767_v52  ;;  %1424 = vmatmul.mubr.msk.f32.vlgmr.msra.gmra.mxu0 %vm701_vm0, %v807_v7  ;;  %vm548_vm1 = vcmp.eq.s32.totalorder %v1670_v42, %v1755_v30  ;;  %vm549_vm2 = vcmp.eq.s32.totalorder %v531_v41, %v1755_v30  ;;  %v950_v8 = vld [vmem:[%s1809_s10 + $0x38] sm:$0xff] }
 0x343   : > { %v802_v15 = vmul.f32 %v1523_v3, %v794_v11  ;;  %v788_v16 = vmul.f32 %v1527_v12, %v770_v53  ;;  %1426 = vmatprep.mubr.msk.f32.mxu0 %vm701_vm0, %v808_v10  ;;  %1451 = vmatprep.mubr.msk.f32.mxu1 %vm548_vm1, %v1572_v31  ;;  %vm550_vm3 = vcmp.eq.s32.totalorder %v532_v39, %v1755_v30  ;;  %v541_v52 = vadd.s32 88, %v1670_v42  ;;  %v948_v3 = vld [vmem:[%s1809_s10 + $0x28] sm:$0xff]  ;;  %v949_v11 = vld [vmem:[%s1809_s10 + $0x30] sm:$0xff] }
 0x344   : > { %v809_v17 = vmul.f32 %v1505_v43, %v801_v13  ;;  %v795_v18 = vsub.f32 2.0, %v787_v14  ;;  %vm551_vm4 = vcmp.eq.s32.totalorder %v533_v40, %v1755_v30  ;;  %vm553_vm6 = vcmp.eq.s32.totalorder %v535_v46, %v1755_v30  ;;  %v952_v14 = vld [vmem:[%s1809_s10 + $0x48] sm:$0xff] }
 0x345   : > { %v1529_v19 = vpop.eup %1528  ;;  %v810_v20 = vmul.f32 %v1725_v34, %v802_v15  ;;  %v796_v21 = vsub.f32 2.0, %v788_v16  ;;  %vm554_vm7 = vcmp.eq.s32.totalorder %v536_v47, %v1755_v30  ;;  %vm555_vm8 = vcmp.eq.s32.totalorder %v537_v48, %v1755_v30 }
 0x346   : > { %v803_v22 = vmul.f32 %v1525_v9, %v795_v18  ;;  %v789_v23 = vmul.f32 %v1529_v19, %v773_v56  ;;  %1427 = vmatmul.mubr.msk.f32.gmra.mxu0 %vm701_vm0, %v809_v17  ;;  %vm556_vm9 = vcmp.eq.s32.totalorder %v538_v49, %v1755_v30  ;;  %vm557_vm10 = vcmp.eq.s32.totalorder %v539_v50, %v1755_v30  ;;  %v951_v17 = vld [vmem:[%s1809_s10 + $0x40] sm:$0xff] }
 0x347   : > { %v804_v24 = vmul.f32 %v1527_v12, %v796_v21  ;;  %1429 = vmatprep.mubr.msk.f32.mxu0 %vm701_vm0, %v810_v20  ;;  %vm558_vm11 = vcmp.eq.s32.totalorder %v540_v51, %v1755_v30  ;;  %v542_v53 = vadd.s32 96, %v1670_v42  ;;  %vm559_vm12 = vcmp.eq.s32.totalorder %v541_v52, %v1755_v30  ;;  %v954_v20 = vld [vmem:[%s1809_s10 + $0x58] sm:$0xff] }
 0x348   : > { %v811_v25 = vmul.f32 %v1730_v37, %v803_v22  ;;  %v797_v26 = vsub.f32 2.0, %v789_v23  ;;  %vm561_vm14 = vcmp.eq.s32.totalorder %v543_v54, %v1755_v30  ;;  %v545_v56 = vadd.s32 120, %v1670_v42  ;;  %v953_v23 = vld [vmem:[%s1809_s10 + $0x50] sm:$0xff] }
 0x349   : > { %v812_v27 = vmul.f32 %v1732_v38, %v804_v24  ;;  %vm560_vm13 = vcmp.eq.s32.totalorder %v542_v53, %v1755_v30  ;;  %vm562_vm15 = vcmp.eq.s32.totalorder %v544_v55, %v1755_v30 }
 0x34a   : > { %v805_v28 = vmul.f32 %v1529_v19, %v797_v26  ;;  %1430 = vmatmul.mubr.msk.f32.gmra.mxu0 %vm701_vm0, %v811_v25  ;;  %vm563_vm1 = vcmp.eq.s32.totalorder %v545_v56, %v1755_v30  ;;  %v956_v26 = vld [vmem:[%s1809_s10 + $0x68] sm:$0xff] }
 0x34b   : > { %1432 = vmatprep.mubr.msk.f32.mxu0 %vm701_vm0, %v812_v27 }
 0x34c   : > { %v813_v29 = vmul.f32 %v1738_v45, %v805_v28  ;;  %v534_v45 = vadd.s32 32, %v1670_v42  ;;  %v944_v42 = vld [vmem:[%s1809_s10 + $0x8] sm:$0xff] }
 0x34e   : > { %1433 = vmatmul.mubr.msk.f32.gmra.mxu0 %vm701_vm0, %v813_v29  ;;  %vm552_vm5 = vcmp.eq.s32.totalorder %v534_v45, %v1755_v30  ;;  %v955_v29 = vld [vmem:[%s1809_s10 + $0x60] sm:$0xff] }
 0x402   : > { %v1425_v32 = vpop.f32.mrf.mxu0 }
 0x404   : > { %v904_v33 = vpop.f32.mrf.mxu0 }
 0x406   : > { %v1428_v43 = vpop.f32.mrf.mxu0 }
 0x408   : > { %v914_v34 = vpop.f32.mrf.mxu0 }
 0x40a   : > { %v1431_v35 = vpop.f32.mrf.mxu0 }
 0x40c   : > { %v924_v36 = vpop.f32.mrf.mxu0 }
 0x40e   : > { %v1434_v37 = vpop.f32.mrf.mxu0 }
 0x40f   : > { %1435 = vmatprep.subr.mxu1 %v1434_v37 }
 0x410   : > { %v934_v38 = vpop.f32.mrf.mxu0  ;;  %1436 = vmatpush3.xpose.msra.mxu1 %v1434_v37 }
 0x411   : > { %1437 = vmatprep.subr.mxu1 %v934_v38 }
 0x414   : > { %1438 = vmatpush3.xpose.msra.mxu1 %v934_v38 }
 0x415   : > { %1439 = vmatprep.subr.mxu1 %v1431_v35 }
 0x418   : > { %1440 = vmatpush3.xpose.msra.mxu1 %v1431_v35 }
 0x419   : > { %1441 = vmatprep.subr.mxu1 %v924_v36 }
 0x41c   : > { %1442 = vmatpush3.xpose.msra.mxu1 %v924_v36 }
 0x41d   : > { %1443 = vmatprep.subr.mxu1 %v1428_v43 }
 0x420   : > { %1444 = vmatpush3.xpose.msra.mxu1 %v1428_v43 }
 0x421   : > { %1445 = vmatprep.subr.mxu1 %v914_v34 }
 0x424   : > { %1446 = vmatpush3.xpose.msra.mxu1 %v914_v34  ;;  %v957_v34 = vld [vmem:[%s1809_s10 + $0x70] sm:$0xff] }
 0x425   : > { %1447 = vmatprep.subr.mxu1 %v1425_v32 }
 0x428   : > { %1448 = vmatpush3.xpose.msra.mxu1 %v1425_v32  ;;  %v958_v32 = vld [vmem:[%s1809_s10 + $0x78] sm:$0xff] }
 0x429   : > { %1449 = vmatprep.subr.mxu1 %v904_v33 }
 0x42c   : > { %1450 = vmatpush3.xpose.msra.mxu1 %v904_v33 }
 0x42f   : > { %1452 = vmatmul.mubr.msk.f32.vlgmr.msra.gmra.mxu1 %vm549_vm2, %v1572_v31 }
 0x430   : > { %1454 = vmatprep.mubr.msk.f32.mxu1 %vm550_vm3, %v1572_v31 }
 0x433   : > { %1455 = vmatmul.mubr.msk.f32.gmra.mxu1 %vm551_vm4, %v1572_v31 }
 0x434   : > { %1457 = vmatprep.mubr.msk.f32.mxu1 %vm552_vm5, %v1572_v31 }
 0x437   : > { %1458 = vmatmul.mubr.msk.f32.gmra.mxu1 %vm553_vm6, %v1572_v31 }
 0x438   : > { %1460 = vmatprep.mubr.msk.f32.mxu1 %vm554_vm7, %v1572_v31 }
 0x43b   : > { %1461 = vmatmul.mubr.msk.f32.gmra.mxu1 %vm555_vm8, %v1572_v31 }
 0x43c   : > { %1463 = vmatprep.mubr.msk.f32.mxu1 %vm556_vm9, %v1572_v31 }
 0x43f   : > { %1464 = vmatmul.mubr.msk.f32.gmra.mxu1 %vm557_vm10, %v1572_v31 }
 0x440   : > { %1466 = vmatprep.mubr.msk.f32.mxu1 %vm558_vm11, %v1572_v31 }
 0x443   : > { %1467 = vmatmul.mubr.msk.f32.gmra.mxu1 %vm559_vm12, %v1572_v31 }
 0x444   : > { %1469 = vmatprep.mubr.msk.f32.mxu1 %vm560_vm13, %v1572_v31 }
 0x447   : > { %1470 = vmatmul.mubr.msk.f32.gmra.mxu1 %vm561_vm14, %v1572_v31 }
 0x448   : > { %1472 = vmatprep.mubr.msk.f32.mxu1 %vm562_vm15, %v1572_v31 }
 0x44b   : > { %1473 = vmatmul.mubr.msk.f32.gmra.mxu1 %vm563_vm1, %v1572_v31 }
 0x4ef   : > { %v1453_v57 = vpop.f32.mrf.mxu1 }
 0x4f0   : > { %v1031_v59 = vadd.f32 %v1453_v57, %v944_v42 }
 0x4f1   : > { %v1025_v60 = vpop.f32.mrf.mxu1 }
 0x4f2   : > { %1105 = vst.msk [vmem:[%s1815_s13 + $0x8] sm:$0xff] %vm701_vm0, %v1031_v59  ;;  %v1026_v62 = vadd.f32 %v1025_v60, %v943_v58 }
 0x4f3   : > { %v1456_v63 = vpop.f32.mrf.mxu1 }
 0x4f4   : > { %1104 = vst.msk [vmem:[%s1815_s13] sm:$0xff] %vm701_vm0, %v1026_v62  ;;  %v1041_v1 = vadd.f32 %v1456_v63, %v946_v61 }
 0x4f5   : > { %v1035_v2 = vpop.f32.mrf.mxu1 }
 0x4f6   : > { %1107 = vst.msk [vmem:[%s1815_s13 + $0x18] sm:$0xff] %vm701_vm0, %v1041_v1  ;;  %v1036_v44 = vadd.f32 %v1035_v2, %v945_v0 }
 0x4f7   : > { %v1459_v4 = vpop.f32.mrf.mxu1 }
 0x4f8   : > { %1106 = vst.msk [vmem:[%s1815_s13 + $0x10] sm:$0xff] %vm701_vm0, %v1036_v44  ;;  %v1051_v6 = vadd.f32 %v1459_v4, %v948_v3 }
 0x4f9   : > { %v1045_v7 = vpop.f32.mrf.mxu1 }
 0x4fa   : > { %1109 = vst.msk [vmem:[%s1815_s13 + $0x28] sm:$0xff] %vm701_vm0, %v1051_v6  ;;  %v1046_v9 = vadd.f32 %v1045_v7, %v947_v5 }
 0x4fb   : > { %v1462_v10 = vpop.f32.mrf.mxu1 }
 0x4fc   : > { %1108 = vst.msk [vmem:[%s1815_s13 + $0x20] sm:$0xff] %vm701_vm0, %v1046_v9  ;;  %v1061_v12 = vadd.f32 %v1462_v10, %v950_v8 }
 0x4fd   : > { %v1055_v13 = vpop.f32.mrf.mxu1 }
 0x4fe   : > { %1111 = vst.msk [vmem:[%s1815_s13 + $0x38] sm:$0xff] %vm701_vm0, %v1061_v12  ;;  %v1056_v15 = vadd.f32 %v1055_v13, %v949_v11 }
 0x4ff   : > { %v1465_v16 = vpop.f32.mrf.mxu1 }
 0x500   : > { %1110 = vst.msk [vmem:[%s1815_s13 + $0x30] sm:$0xff] %vm701_vm0, %v1056_v15  ;;  %v1071_v18 = vadd.f32 %v1465_v16, %v952_v14 }
 0x501   : > { %v1065_v19 = vpop.f32.mrf.mxu1 }
 0x502   : > { %1113 = vst.msk [vmem:[%s1815_s13 + $0x48] sm:$0xff] %vm701_vm0, %v1071_v18  ;;  %v1066_v21 = vadd.f32 %v1065_v19, %v951_v17 }
 0x503   : > { %v1468_v22 = vpop.f32.mrf.mxu1 }
 0x504   : > { %1112 = vst.msk [vmem:[%s1815_s13 + $0x40] sm:$0xff] %vm701_vm0, %v1066_v21  ;;  %v1081_v24 = vadd.f32 %v1468_v22, %v954_v20 }
 0x505   : > { %v1075_v25 = vpop.f32.mrf.mxu1 }
 0x506   : > { %1115 = vst.msk [vmem:[%s1815_s13 + $0x58] sm:$0xff] %vm701_vm0, %v1081_v24  ;;  %v1076_v27 = vadd.f32 %v1075_v25, %v953_v23 }
 0x507   : > { %v1471_v28 = vpop.f32.mrf.mxu1 }
 0x508   : > { %1114 = vst.msk [vmem:[%s1815_s13 + $0x50] sm:$0xff] %vm701_vm0, %v1076_v27  ;;  %v1091_v30 = vadd.f32 %v1471_v28, %v956_v26 }
 0x509   : > { %v1085_v31 = vpop.f32.mrf.mxu1 }
 0x50a   : > { %1117 = vst.msk [vmem:[%s1815_s13 + $0x68] sm:$0xff] %vm701_vm0, %v1091_v30  ;;  %v1086_v33 = vadd.f32 %v1085_v31, %v955_v29 }
 0x50b   : > { %v1474_v43 = vpop.f32.mrf.mxu1 }
 0x50c   : > { %1116 = vst.msk [vmem:[%s1815_s13 + $0x60] sm:$0xff] %vm701_vm0, %v1086_v33  ;;  %v1101_v35 = vadd.f32 %v1474_v43, %v958_v32 }
 0x50d   : > { %v1095_v36 = vpop.f32.mrf.mxu1 }
 0x50e   : > { %1119 = vst.msk [vmem:[%s1815_s13 + $0x78] sm:$0xff] %vm701_vm0, %v1101_v35  ;;  %v1096_v37 = vadd.f32 %v1095_v36, %v957_v34 }
 0x510   : > { %1118 = vst.msk [vmem:[%s1815_s13 + $0x70] sm:$0xff] %vm701_vm0, %v1096_v37 }
 0x511 PF: > { %s15_s15 = sadd.s32 1, %s1566_s15  }
 0x512   : > { %p12_p2 = scmp.ge.s32.totalorder %s15_s15, 4  }
 0x514   :  { %14 = sbr.rel (!%p12_p2) target bundleno = 1 (0x1), region = 74 }
 0x519   :  { %1142 = vsyncpa [#allocation3], 1 }
 0x51a   :  { %1144 = vsyncpa [#allocation3 + $0x1], 1 }

</bundles_post_ra>
